<compile_context>
chip_gen: v6e
topology: v6e:2x2x1
jax: 0.10.0
libtpu: 0.0.40
codegen_flags: <defaults>
</compile_context>

<pallas_src>
import jax
import jax.numpy as jnp
from jax.experimental import pallas as pl
from jax.experimental.pallas import tpu as pltpu


def _model_kernel(x_ref, w_ref, b_ref, out_ref):
    # x_ref: (N, D) f32   w_ref: (3, D, D) f32   b_ref: (3, D) f32
    # out_ref: (1, 1) f32 in SMEM
    x = x_ref[...]                      # already f32, no cast needed

    w1 = w_ref[0]                       # static leading-axis slices: free views
    w2 = w_ref[1]
    w3 = w_ref[2]
    b1 = b_ref[0:1, :]                  # keep 2-D (1, D) rows for broadcasting
    b2 = b_ref[1:2, :]
    b3 = b_ref[2:3, :]

    # linear1
    a1 = jnp.dot(x, w1, preferred_element_type=jnp.float32) + b1
    # DanglingAttention's own Linear
    a2 = jnp.dot(a1, w2, preferred_element_type=jnp.float32) + b2
    # DanglingBias linear (d_linear); its bias b3 is the "dangling" bias returned
    a3 = jnp.dot(a2, w3, preferred_element_type=jnp.float32) + b3

    # (act2 + bias).sum()  ==  sum(act2) + N * sum(b3)   (no (N,D) broadcast)
    n_rows = x_ref.shape[0]
    out_ref[0, 0] = jnp.sum(a3) + jnp.float32(n_rows) * jnp.sum(b3)


def model_container_forward(x, params):
    """x: (N, D) f32. params: {'w_packed': (3,D,D), 'b_packed': (3,D)}.

    Weights are stored as (D_in, D_out) == torch weight.T so the kernel does x @ W.
    """
    vmem = pl.BlockSpec(memory_space=pltpu.MemorySpace.VMEM)
    smem = pl.BlockSpec(memory_space=pltpu.MemorySpace.SMEM)
    out = pl.pallas_call(
        _model_kernel,
        out_shape=jax.ShapeDtypeStruct((1, 1), jnp.float32),
        in_specs=[vmem, vmem, vmem],
        out_specs=smem,
    )(x, params["w_packed"], params["b_packed"])
    return out[0, 0]


def init_params(key, dim=16):
    """Deterministic init mimicking torch.nn.Linear default (uniform +/- 1/sqrt(dim)).

    Packs the three layers' weights into one (3, D, D) array and biases into
    one (3, D) array so the kernel stages two operand DMAs instead of six.
    """
    bound = 1.0 / jnp.sqrt(jnp.float32(dim))
    keys = jax.random.split(key, 6)
    mk_w = lambda k: jax.random.uniform(k, (dim, dim), jnp.float32, -bound, bound)
    mk_b = lambda k: jax.random.uniform(k, (dim,), jnp.float32, -bound, bound)
    w_packed = jnp.stack([mk_w(keys[0]), mk_w(keys[2]), mk_w(keys[4])], axis=0)
    b_packed = jnp.stack([mk_b(keys[1]), mk_b(keys[3]), mk_b(keys[5])], axis=0)
    return {"w_packed": w_packed, "b_packed": b_packed}


def reference_forward(x, p):
    w1, w2, w3 = p["w_packed"][0], p["w_packed"][1], p["w_packed"][2]
    b1, b2, b3 = p["b_packed"][0], p["b_packed"][1], p["b_packed"][2]
    a1 = x @ w1 + b1
    a2 = a1 @ w2 + b2
    a3 = a2 @ w3 + b3
    return jnp.sum(a3 + b3)


if __name__ == "__main__":
    dim = 16
    batch = 8
    key = jax.random.PRNGKey(0)
    k_x, k_p = jax.random.split(key)

    x = jax.random.normal(k_x, (batch, dim), jnp.float32)
    params = init_params(k_p, dim)

    out = jax.block_until_ready(model_container_forward(x, params))
    ref = jax.block_until_ready(reference_forward(x, params))

    assert jnp.allclose(out, ref, rtol=1e-5, atol=1e-5), (out, ref)
    print("KERNEL_OK")
</pallas_src>

<mosaic_0001>
module attributes {stable_mosaic.version = 11 : i64} {
  func.func @_model_kernel(%arg0: memref<8x16xf32, #tpu.memory_space<vmem>>, %arg1: memref<3x16x16xf32, #tpu.memory_space<vmem>>, %arg2: memref<3x16xf32, #tpu.memory_space<vmem>>, %arg3: memref<1x1xf32, #tpu.memory_space<smem>>) attributes {dimension_semantics = [], scalar_prefetch = 0 : i64, scratch_operands = 0 : i64, tpu.core_type = #tpu.core_type<tc>} {
    %c0 = arith.constant 0 : index
    %c0_0 = arith.constant 0 : index
    %0 = vector.load %arg0[%c0, %c0_0] : memref<8x16xf32, #tpu.memory_space<vmem>>, vector<8x16xf32>
    %c0_1 = arith.constant 0 : index
    %c0_2 = arith.constant 0 : index
    %c0_3 = arith.constant 0 : index
    %1 = vector.load %arg1[%c0_1, %c0_2, %c0_3] : memref<3x16x16xf32, #tpu.memory_space<vmem>>, vector<1x16x16xf32>
    %2 = vector.shape_cast %1 : vector<1x16x16xf32> to vector<16x16xf32>
    %c1 = arith.constant 1 : index
    %c0_4 = arith.constant 0 : index
    %c0_5 = arith.constant 0 : index
    %3 = vector.load %arg1[%c1, %c0_4, %c0_5] : memref<3x16x16xf32, #tpu.memory_space<vmem>>, vector<1x16x16xf32>
    %4 = vector.shape_cast %3 : vector<1x16x16xf32> to vector<16x16xf32>
    %c2 = arith.constant 2 : index
    %c0_6 = arith.constant 0 : index
    %c0_7 = arith.constant 0 : index
    %5 = vector.load %arg1[%c2, %c0_6, %c0_7] : memref<3x16x16xf32, #tpu.memory_space<vmem>>, vector<1x16x16xf32>
    %6 = vector.shape_cast %5 : vector<1x16x16xf32> to vector<16x16xf32>
    %c0_8 = arith.constant 0 : index
    %c0_9 = arith.constant 0 : index
    %7 = vector.load %arg2[%c0_8, %c0_9] : memref<3x16xf32, #tpu.memory_space<vmem>>, vector<1x16xf32>
    %c1_10 = arith.constant 1 : index
    %c0_11 = arith.constant 0 : index
    %8 = vector.load %arg2[%c1_10, %c0_11] : memref<3x16xf32, #tpu.memory_space<vmem>>, vector<1x16xf32>
    %c2_12 = arith.constant 2 : index
    %c0_13 = arith.constant 0 : index
    %9 = vector.load %arg2[%c2_12, %c0_13] : memref<3x16xf32, #tpu.memory_space<vmem>>, vector<1x16xf32>
    %cst = arith.constant dense<0.000000e+00> : vector<8x16xf32>
    %10 = tpu.matmul %0, %2, %cst {dimension_numbers = #tpu.dot_dimension_numbers<[1], [0], [0], [1], [0, 0, 1, 1], [], []>} : vector<8x16xf32>, vector<16x16xf32>, vector<8x16xf32> -> vector<8x16xf32>
    %11 = vector.broadcast %7 : vector<1x16xf32> to vector<8x16xf32>
    %12 = arith.addf %10, %11 : vector<8x16xf32>
    %cst_14 = arith.constant dense<0.000000e+00> : vector<8x16xf32>
    %13 = tpu.matmul %12, %4, %cst_14 {dimension_numbers = #tpu.dot_dimension_numbers<[1], [0], [0], [1], [0, 0, 1, 1], [], []>} : vector<8x16xf32>, vector<16x16xf32>, vector<8x16xf32> -> vector<8x16xf32>
    %14 = vector.broadcast %8 : vector<1x16xf32> to vector<8x16xf32>
    %15 = arith.addf %13, %14 : vector<8x16xf32>
    %cst_15 = arith.constant dense<0.000000e+00> : vector<8x16xf32>
    %16 = tpu.matmul %15, %6, %cst_15 {dimension_numbers = #tpu.dot_dimension_numbers<[1], [0], [0], [1], [0, 0, 1, 1], [], []>} : vector<8x16xf32>, vector<16x16xf32>, vector<8x16xf32> -> vector<8x16xf32>
    %17 = vector.broadcast %9 : vector<1x16xf32> to vector<8x16xf32>
    %18 = arith.addf %16, %17 : vector<8x16xf32>
    %19 = vector.shape_cast %18 : vector<8x16xf32> to vector<1x8x16xf32>
    %cst_16 = arith.constant dense<0.000000e+00> : vector<1xf32>
    %20 = vector.multi_reduction <add>, %19, %cst_16 [1, 2] : vector<1x8x16xf32> to vector<1xf32>
    %21 = vector.shape_cast %20 : vector<1xf32> to vector<1x1x1xf32>
    %22 = vector.extract %21[0, 0, 0] : f32 from vector<1x1x1xf32>
    %23 = vector.shape_cast %9 : vector<1x16xf32> to vector<1x1x16xf32>
    %cst_17 = arith.constant dense<0.000000e+00> : vector<1xf32>
    %24 = vector.multi_reduction <add>, %23, %cst_17 [1, 2] : vector<1x1x16xf32> to vector<1xf32>
    %25 = vector.shape_cast %24 : vector<1xf32> to vector<1x1x1xf32>
    %26 = vector.extract %25[0, 0, 0] : f32 from vector<1x1x1xf32>
    %cst_18 = arith.constant 8.000000e+00 : f32
    %27 = arith.mulf %cst_18, %26 : f32
    %28 = arith.addf %22, %27 : f32
    %c0_19 = arith.constant 0 : index
    %c0_20 = arith.constant 0 : index
    %29 = memref.load %arg3[%c0_19, %c0_20] : memref<1x1xf32, #tpu.memory_space<smem>>
    memref.store %28, %arg3[%c0_19, %c0_20] : memref<1x1xf32, #tpu.memory_space<smem>>
    return
  }
}

</mosaic_0001>

<bundles_post_ra>
// kernel: tpu_custom_call.1
= control target key start
LH: loop header
LB: loop body
LE: loop exit
PB: predicated region body
PF: predicated region fallthrough
CT: control target
= control target key end

     0   :  { %8 = vsyncpa [#allocation3], 0  ;;  %s501_s0 = inlined_call_operand.hbm [shape: f32[8,16], index: 0, kind: input, shape index: {}]   ;;  %s502_s1 = inlined_call_operand.hbm [shape: f32[3,16,16], index: 1, kind: input, shape index: {}]   ;;  %s503_s2 = inlined_call_operand.hbm [shape: f32[3,16], index: 2, kind: input, shape index: {}]   ;;  %s504_s3 = inlined_call_operand.hbm [shape: f32[1,1], index: 3, kind: output, shape index: {}]  }
   0x1   :  { %9 = vsyncpa [#allocation6], 0 }
   0x2   :  { %10 = vsyncpa [#allocation4], 0  ;;  %s457_s12 = smov [#allocation5]  }
   0x3   :  { %s26_s13 = sshll.u32 %s457_s12, 4  ;;  %s27_s13 = int_to_ptr.vmem [resolvable:$true] %s26_s13 }
   0x4   :  { %s391_s14 = scalar_lea.vmem %s27_s13, 768  ;;  %p396_p1 = scmp.lt.s32.totalorder %s27_s13, %s27_s13 }
   0x5   :  { %p392_p0 = scmp.ne.s32.totalorder %s27_s13, %s391_s14  ;;  %p397_p2 = scmp.lt.s32.totalorder %s391_s14, %s391_s14 }
   0x7   :  { %p398_p3 = por %p397_p2, %p396_p1 }
   0x9   :  { %p399_p4 = pnand %p398_p3, %p392_p0 }
   0xb   :  { %402 = shalt.err (!%p399_p4)
}
   0xc   :  { %s458_s15 = smov 128   ;;  %s459_s16 = smov 8  }
   0xd   :  { %32 = dma.hbm_to_vmem [thread:$0]  %s502_s1, 768, %s27_s13, [#allocation6], %s458_s15, %s458_s15, %s459_s16  }
   0xe   :  { %s460_s19 = smov [#allocation2]   ;;  %s461_s21 = smov [#allocation7]  }
   0xf   :  { %s17_s20 = sshll.u32 %s460_s19, 4  ;;  %s39_s22 = sshll.u32 %s461_s21, 4  ;;  %s18_s20 = int_to_ptr.vmem [resolvable:$true] %s17_s20  ;;  %s40_s22 = int_to_ptr.vmem [resolvable:$true] %s39_s22 }
  0x10   :  { %s411_s23 = scalar_lea.vmem %s18_s20, 128  ;;  %p416_p6 = scmp.lt.s32.totalorder %s18_s20, %s18_s20 }
  0x11   :  { %p412_p5 = scmp.ne.s32.totalorder %s18_s20, %s411_s23  ;;  %p417_p7 = scmp.lt.s32.totalorder %s411_s23, %s411_s23 }
  0x13   :  { %p418_p8 = por %p417_p7, %p416_p6 }
  0x15   :  { %p419_p9 = pnand %p418_p8, %p412_p5 }
  0x17   :  { %422 = shalt.err (!%p419_p9)
}
  0x18   :  { %20 = dma.hbm_to_vmem [thread:$0]  %s501_s0, 128, %s18_s20, [#allocation3]  }
  0x19   :  { %s431_s26 = scalar_lea.vmem %s40_s22, 64  ;;  %p436_p11 = scmp.lt.s32.totalorder %s40_s22, %s40_s22 }
  0x1a   :  { %p432_p10 = scmp.ne.s32.totalorder %s40_s22, %s431_s26  ;;  %p437_p12 = scmp.lt.s32.totalorder %s431_s26, %s431_s26 }
  0x1c   :  { %p438_p13 = por %p437_p12, %p436_p11 }
  0x1e   :  { %p439_p0 = pnand %p438_p13, %p432_p10 }
  0x20   :  { %442 = shalt.err (!%p439_p0)
}
  0x21   :  { %42 = dma.hbm_to_vmem [thread:$0]  %s503_s2, 64, %s40_s22, [#allocation6]  }
  0x22   :  { %451 = dma.done.wait [#allocation3], 128  }
  0x23   :  { %452 = vsyncadd [#allocation3], 4294967168 }
  0x24   :  { %453 = dma.done.wait [#allocation6], 832  }
  0x25   :  { %454 = vsyncadd [#allocation6], 4294966464  ;;  %v462_v0 = vmov 0.0   ;;  %vm463_vm0 = vmmov 0   ;;  %v54_v1 = vld [vmem:[#allocation5 + $0x8] sm:$0xff]  ;;  %v53_v2 = vld [vmem:[#allocation5] sm:$0xff]  ;;  %v219_v16 = vlaneseq }
  0x26   :  { %350 = vmatprep.subr.mxu0 %v462_v0  ;;  %354 = vmatprep.mubr.msk.f32.mxu0 %vm463_vm0, %v462_v0  ;;  %v52_v3 = vld [vmem:[#allocation2] sm:$0xff]  ;;  %vm68_vm1 = vcmask 130048   ;;  %v56_v5 = vld [vmem:[#allocation5 + $0x10] sm:$0xff]  ;;  %v60_v6 = vld [vmem:[#allocation5 + $0x28] sm:$0xff]  ;;  %vm306_vm2 = vcmask 122880   ;;  %s464_s30 = smov [#allocation8]  }
  0x27   :  { %357 = vmatprep.subr.mxu1 %v462_v0  ;;  %361 = vmatprep.mubr.msk.f32.mxu1 %vm463_vm0, %v462_v0  ;;  %v57_v4 = vld [vmem:[#allocation5 + $0x18] sm:$0xff]  ;;  %v336_v7 = vld [vmem:[#allocation7] ss:$0 sm:$0xff]  ;;  %v59_v11 = vld [vmem:[#allocation5 + $0x20] sm:$0xff]  ;;  %v220_v17 = vshrl.u32 %v219_v16, 7 }
  0x28   :  { %351 = vmatpush3.msra.mxu0 %v54_v1  ;;  %358 = vmatpush3.msra.mxu1 %v57_v4  ;;  %v338_v12 = vld [vmem:[#allocation7 + $0x1] ss:$0 sm:$0xff]  ;;  %v63_v19 = vld [vmem:[#allocation7 + $0x2] sm:$0x1] }
  0x29   :  { %352 = vmatprep.subr.mxu0 %v462_v0  ;;  %359 = vmatprep.subr.mxu1 %v462_v0  ;;  %v221_v18 = vsub.s32 0, %v220_v17  ;;  %v307_v25 = vsel %vm306_vm2, %v63_v19, 0.0 }
  0x2a   :  { %353 = vmatpush3.msra.mxu0 %v53_v2  ;;  %360 = vmatpush3.msra.mxu1 %v56_v5 }
  0x2b   :  { %355 = vmatmul.mubr.msk.f32.vlgmr.msra.gmra.mxu0 %vm68_vm1, %v52_v3  ;;  %364 = vmatprep.subr.mxu0 %v462_v0  ;;  %v222_v20 = vrot.slane %v63_v19, %v221_v18 }
  0x2c   :  { %368 = vmatprep.mubr.msk.f32.mxu0 %vm463_vm0, %v462_v0  ;;  %365 = vmatpush3.msra.mxu0 %v60_v6 }
  0x2d   :  { %366 = vmatprep.subr.mxu0 %v462_v0 }
  0x2e   :  { %367 = vmatpush3.msra.mxu0 %v59_v11 }
  0xeb   :  { %v138_v8 = vpop.f32.mrf.mxu0 }
  0xec   :  { %v139_v9 = vadd.f32 %v336_v7, %v138_v8 }
  0xed   :  { %v356_v10 = vpop.f32.mrf.mxu0 }
  0xee   :  { %362 = vmatmul.mubr.msk.f32.vlgmr.msra.gmra.mxu1 %vm68_vm1, %v139_v9 }
 0x1ae   :  { %v215_v13 = vpop.f32.mrf.mxu1 }
 0x1af   :  { %v216_v14 = vadd.f32 %v338_v12, %v215_v13 }
 0x1b0   :  { %v363_v15 = vpop.f32.mrf.mxu1 }
 0x1b1   :  { %369 = vmatmul.mubr.msk.f32.vlgmr.msra.gmra.mxu0 %vm68_vm1, %v216_v14 }
 0x271   :  { %v292_v21 = vpop.f32.mrf.mxu0 }
 0x272   :  { %v293_v22 = vadd.f32 %v292_v21, %v222_v20 }
 0x273   :  { %v370_v23 = vpop.f32.mrf.mxu0 }
 0x274   :  { %v296_v24 = vsel %vm68_vm1, %v293_v22, 0.0 }
 0x275   :  { %297 = vadd.xlane.f32.xlu0 %v296_v24 }
 0x279   :  { %308 = vadd.xlane.f32.xlu0 %v307_v25 }
 0x2fe   :  { %v298_v26 = vpop.xlane.xlu0 %297 }
 0x2ff   :  { %v299_v27 = vrot.slane %v298_v26, 4 }
 0x301   :  { %v300_v28 = vadd.f32 %v299_v27, %v298_v26 }
 0x302   :  { %v309_v29 = vpop.xlane.xlu0 %308 }
 0x303   :  { %v301_v30 = vrot.slane %v300_v28, 2  ;;  %v310_v31 = vrot.slane %v309_v29, 4 }
 0x305   :  { %v311_v32 = vadd.f32 %v310_v31, %v309_v29  ;;  %v302_v33 = vadd.f32 %v301_v30, %v300_v28 }
 0x307   :  { %v312_v34 = vrot.slane %v311_v32, 2  ;;  %v303_v35 = vrot.slane %v302_v33, 1 }
 0x309   :  { %v313_v36 = vadd.f32 %v312_v34, %v311_v32  ;;  %v304_v37 = vadd.f32 %v303_v35, %v302_v33 }
 0x30b   :  { %371 = vpush %v304_v37  ;;  %v314_v38 = vrot.slane %v313_v36, 1 }
 0x30d   :  { %v315_v39 = vadd.f32 %v314_v38, %v313_v36 }
 0x30f   :  { %373 = vpush %v315_v39 }
 0x33c   :  { %s372_s0 = spop %371 }
 0x340   :  { %s374_s2 = spop %373 }
 0x341   :  { %s317_s28 = smul.f32 8.0, %s374_s2 }
 0x343   :  { %s318_s29 = sadd.f32 %s372_s0, %s317_s28 }
 0x345   :  { %320 = sst [smem:[#allocation8]] %s318_s29 }
 0x346   :  { %328 = dma.smem_to_hbm %s464_s30, 16, %s504_s3, [#allocation4]  }
 0x347   :  { %455 = dma.done.wait [#allocation4], 16  }
 0x348   :  { %456 = vsyncadd [#allocation4], 4294967280 }
 0x349   :  { %332 = sfence }
 0x34a   :  { %333 = vsyncpa [#allocation3], 1 }
 0x34b   :  { %334 = vsyncpa [#allocation6], 1 }
 0x34c   :  { %335 = vsyncpa [#allocation4], 1 }

</bundles_post_ra>
